<compile_context>
chip_gen: v6e
topology: v6e:2x2x1
jax: 0.10.0
libtpu: 0.0.40
codegen_flags: <defaults>
</compile_context>

<pallas_src>
import functools
import math

import jax
import jax.numpy as jnp
import numpy as np
from jax.experimental import pallas as pl
from jax.experimental.pallas import tpu as pltpu

ENCODER_REGULAR_VTH = 0.999

# Minimum sublane multiple for the second-to-last block dim, per itemsize.
_SUBLANE = {1: 32, 2: 16, 4: 8}


def _pop_spike_encoder_kernel(obs_ref, onehot_ref, mean_ref, gamma_ref, out_ref,
                              *, spike_ts):
    # obs_ref   : (tb, D)    f32   batch tile of raw observations
    # onehot_ref: (D, N)     f32   resident selection matrix, E[d, d*P+p] = 1
    # mean_ref  : (1, N)     f32   resident
    # gamma_ref : (1, N)     f32   resident, gamma = -0.5 / std^2
    # out_ref   : (T, tb, N) out_dtype
    #
    # Population expansion on the (otherwise idle) MXU: obs_rep[b, d*P+p] = obs[b, d].
    obs_rep = jnp.dot(obs_ref[...], onehot_ref[...],
                      preferred_element_type=jnp.float32)          # (tb, N)

    diff = obs_rep - mean_ref[...]
    act = jnp.exp(diff * diff * gamma_ref[...])                    # EUP exp

    # Regular-spike integrate & fire; spike_ts is small & static -> unrolled.
    # Each step: add, compare, cast+store (full-width lane-dense vst), select.
    volt = jnp.zeros_like(act)
    for step in range(spike_ts):
        volt = volt + act
        fired = volt > ENCODER_REGULAR_VTH
        out_ref[step] = fired.astype(out_ref.dtype)
        volt = jnp.where(fired, volt - ENCODER_REGULAR_VTH, volt)


def _round_up(x, m):
    return ((x + m - 1) // m) * m


def _choose_batch_tile(batch, n, d, t, out_itemsize, budget_bytes=20 * 1024 * 1024):
    """Largest sublane-aligned batch tile whose VMEM footprint fits the budget.

    Accounts for the double-buffered output block in its real dtype, the
    double-buffered obs block, the in-kernel (tb, N) f32 temporaries
    (obs_rep/diff/act/volt), and the resident one-hot/mean/gamma blocks.
    Budget kept well under v7x's 64 MiB physical VMEM per TensorCore.
    """
    sub = _SUBLANE.get(out_itemsize, 8)

    def block_bytes(tb):
        return (2 * out_itemsize * t * tb * n      # output block (double-buffered)
                + 2 * 4 * tb * d                   # obs block (double-buffered)
                + 4 * 4 * tb * n                   # f32 temporaries
                + 4 * (d * n + 2 * n))             # resident one-hot / mean / gamma

    tb = 1024
    while tb > sub and block_bytes(tb) > budget_bytes:
        tb //= 2

    # v7x megacore: make sure the grid has >= 2 steps when the batch allows it,
    # so dimension_semantics=("parallel",) actually feeds both TensorCores.
    if batch > sub:
        tb = min(tb, _round_up(pl.cdiv(batch, 2), sub))

    if tb >= batch:
        return batch
    return max((tb // sub) * sub, sub)


def pop_spike_encoder_regular_spike(obs, mean, std, spike_ts, *,
                                    layout="bnt", batch_tile=None,
                                    out_dtype=jnp.int8):
    """obs: (B, obs_dim); mean/std: (obs_dim, pop_dim).

    layout="bnt" -> (B, obs_dim*pop_dim, spike_ts)   (PyTorch pop_spikes layout)
    layout="tbn" -> (spike_ts, B, obs_dim*pop_dim)   (time-major fast path, no transpose)
    out_dtype: int8 (recommended; spikes are exactly {0,1}) or float32/bfloat16.
    """
    B, D = obs.shape
    Dm, P = mean.shape
    assert Dm == D
    N = D * P
    out_itemsize = jnp.dtype(out_dtype).itemsize

    # Resident parameters.
    onehot = jnp.asarray(np.repeat(np.eye(D, dtype=np.float32), P, axis=1))  # (D, N)
    mean_flat = mean.reshape(1, N).astype(jnp.float32)
    gamma_flat = (-0.5 / (std * std)).reshape(1, N).astype(jnp.float32)

    if batch_tile is not None:
        tb = min(batch_tile, B)
    else:
        tb = _choose_batch_tile(B, N, D, spike_ts, out_itemsize)
    grid = (pl.cdiv(B, tb),)

    cost = pl.CostEstimate(
        flops=B * (2 * D * N) + B * N * (3 + 4 * spike_ts),
        transcendentals=B * N,
        bytes_accessed=(4 * (B * D + D * N + 2 * N)
                        + spike_ts * B * N * out_itemsize),
    )

    out = pl.pallas_call(
        functools.partial(_pop_spike_encoder_kernel, spike_ts=spike_ts),
        out_shape=jax.ShapeDtypeStruct((spike_ts, B, N), out_dtype),
        grid=grid,
        in_specs=[
            pl.BlockSpec((tb, D), lambda i: (i, 0)),   # obs tile over batch
            pl.BlockSpec((D, N), lambda i: (0, 0)),    # one-hot expansion (resident)
            pl.BlockSpec((1, N), lambda i: (0, 0)),    # mean (resident)
            pl.BlockSpec((1, N), lambda i: (0, 0)),    # gamma (resident)
        ],
        out_specs=pl.BlockSpec((spike_ts, tb, N), lambda i: (0, i, 0)),
        compiler_params=pltpu.CompilerParams(
            dimension_semantics=("parallel",),         # batch axis -> both v7x TCs
            vmem_limit_bytes=48 * 1024 * 1024,
        ),
        cost_estimate=cost,
    )(obs.astype(jnp.float32), onehot, mean_flat, gamma_flat)

    if layout == "tbn":
        return out
    # PyTorch layout (B, N, T): transpose the (already small, int8 by default)
    # result; prefer layout="tbn" downstream to skip even this.
    return jnp.transpose(out, (1, 2, 0))


def make_params(obs_dim, pop_dim, mean_range, std):
    """Deterministic parameter init mirroring the PyTorch __init__."""
    if pop_dim > 1:
        delta_mean = (mean_range[1] - mean_range[0]) / (pop_dim - 1)
        row = mean_range[0] + delta_mean * np.arange(pop_dim, dtype=np.float32)
    else:
        row = np.zeros((1,), dtype=np.float32)
    mean = np.broadcast_to(row[None, :], (obs_dim, pop_dim)).astype(np.float32)
    std_arr = np.full((obs_dim, pop_dim), std, dtype=np.float32)
    return jnp.asarray(mean), jnp.asarray(std_arr)


def _reference_numpy(obs, mean, std, spike_ts):
    obs = np.asarray(obs, dtype=np.float32)
    mean = np.asarray(mean, dtype=np.float32)
    std = np.asarray(std, dtype=np.float32)
    B, D = obs.shape
    P = mean.shape[1]
    act = np.exp(-0.5 * (obs[:, :, None] - mean[None]) ** 2 / std[None] ** 2)
    act = act.reshape(B, D * P)
    volt = np.zeros((B, D * P), dtype=np.float32)
    spikes = np.zeros((B, D * P, spike_ts), dtype=np.float32)
    for step in range(spike_ts):
        volt = volt + act
        spikes[:, :, step] = (volt > ENCODER_REGULAR_VTH).astype(np.float32)
        volt = volt - spikes[:, :, step] * ENCODER_REGULAR_VTH
    return spikes


if __name__ == "__main__":
    obs_dim = 8
    pop_dim = 16          # N = obs_dim * pop_dim = 128: one full lane width
    spike_ts = 8
    mean_range = (-3.0, 3.0)
    std_val = math.sqrt(0.15)

    mean_p, std_p = make_params(obs_dim, pop_dim, mean_range, std_val)

    batch = 2
    key = jax.random.PRNGKey(0)
    obs = jax.random.normal(key, (batch, obs_dim), dtype=jnp.float32)
    ref = _reference_numpy(obs, mean_p, std_p, spike_ts)

    # --- default fast path: int8 output, PyTorch (B, N, T) layout ---
    spikes_i8 = jax.block_until_ready(
        pop_spike_encoder_regular_spike(obs, mean_p, std_p, spike_ts))
    assert spikes_i8.dtype == jnp.int8
    np.testing.assert_allclose(np.asarray(spikes_i8).astype(np.float32), ref,
                               rtol=1e-5, atol=1e-5)

    # --- float32, time-major (no transpose) ---
    spikes_f32_tbn = jax.block_until_ready(
        pop_spike_encoder_regular_spike(obs, mean_p, std_p, spike_ts,
                                        layout="tbn", out_dtype=jnp.float32))
    np.testing.assert_allclose(
        np.transpose(np.asarray(spikes_f32_tbn), (1, 2, 0)), ref,
        rtol=1e-5, atol=1e-5)

    # --- batch-tiled parallel grid, int8 (2 blocks of 32 rows) ---
    obs64 = jnp.concatenate([obs] * 32, axis=0)                     # (64, obs_dim)
    ref64 = np.concatenate([ref] * 32, axis=0)
    spikes64 = jax.block_until_ready(
        pop_spike_encoder_regular_spike(obs64, mean_p, std_p, spike_ts,
                                        batch_tile=32))
    np.testing.assert_allclose(np.asarray(spikes64).astype(np.float32), ref64,
                               rtol=1e-5, atol=1e-5)

    # --- batch-tiled parallel grid, float32 (3 blocks of 8 rows) ---
    obs24 = jnp.concatenate([obs] * 12, axis=0)                     # (24, obs_dim)
    ref24 = np.concatenate([ref] * 12, axis=0)
    spikes24 = jax.block_until_ready(
        pop_spike_encoder_regular_spike(obs24, mean_p, std_p, spike_ts,
                                        batch_tile=8, out_dtype=jnp.float32))
    np.testing.assert_allclose(np.asarray(spikes24), ref24, rtol=1e-5, atol=1e-5)

    print("KERNEL_OK")
</pallas_src>

<mosaic_0001>
module attributes {stable_mosaic.version = 11 : i64} {
  func.func @_pop_spike_encoder_kernel(%arg0: i32, %arg1: memref<2x8xf32, #tpu.memory_space<vmem>>, %arg2: memref<8x128xf32, #tpu.memory_space<vmem>>, %arg3: memref<1x128xf32, #tpu.memory_space<vmem>>, %arg4: memref<1x128xf32, #tpu.memory_space<vmem>>, %arg5: memref<8x2x128xi8, #tpu.memory_space<vmem>>) attributes {dimension_semantics = [#tpu.dimension_semantics<parallel>], iteration_bounds = array<i64: 1>, scalar_prefetch = 0 : i64, scratch_operands = 0 : i64, tpu.core_type = #tpu.core_type<tc>, window_params = [{transform_indices = @transform_0, window_bounds = array<i64: 2, 8>}, {pipeline_mode = #tpu.pipeline_mode<synchronous>, transform_indices = @transform_1, window_bounds = array<i64: 8, 128>}, {pipeline_mode = #tpu.pipeline_mode<synchronous>, transform_indices = @transform_2, window_bounds = array<i64: 1, 128>}, {pipeline_mode = #tpu.pipeline_mode<synchronous>, transform_indices = @transform_3, window_bounds = array<i64: 1, 128>}, {transform_indices = @transform_4, window_bounds = array<i64: 8, 2, 128>}]} {
    %c0 = arith.constant 0 : index
    %c0_0 = arith.constant 0 : index
    %0 = vector.load %arg1[%c0, %c0_0] : memref<2x8xf32, #tpu.memory_space<vmem>>, vector<2x8xf32>
    %c0_1 = arith.constant 0 : index
    %c0_2 = arith.constant 0 : index
    %1 = vector.load %arg2[%c0_1, %c0_2] : memref<8x128xf32, #tpu.memory_space<vmem>>, vector<8x128xf32>
    %cst = arith.constant dense<0.000000e+00> : vector<2x128xf32>
    %2 = tpu.matmul %0, %1, %cst {dimension_numbers = #tpu.dot_dimension_numbers<[1], [0], [0], [1], [0, 0, 1, 1], [], []>} : vector<2x8xf32>, vector<8x128xf32>, vector<2x128xf32> -> vector<2x128xf32>
    %c0_3 = arith.constant 0 : index
    %c0_4 = arith.constant 0 : index
    %3 = vector.load %arg3[%c0_3, %c0_4] : memref<1x128xf32, #tpu.memory_space<vmem>>, vector<1x128xf32>
    %4 = vector.broadcast %3 : vector<1x128xf32> to vector<2x128xf32>
    %5 = arith.subf %2, %4 : vector<2x128xf32>
    %6 = arith.mulf %5, %5 : vector<2x128xf32>
    %c0_5 = arith.constant 0 : index
    %c0_6 = arith.constant 0 : index
    %7 = vector.load %arg4[%c0_5, %c0_6] : memref<1x128xf32, #tpu.memory_space<vmem>>, vector<1x128xf32>
    %8 = vector.broadcast %7 : vector<1x128xf32> to vector<2x128xf32>
    %9 = arith.mulf %6, %8 : vector<2x128xf32>
    %10 = math.exp %9 : vector<2x128xf32>
    %cst_7 = arith.constant 0.000000e+00 : f32
    %11 = vector.broadcast %cst_7 : f32 to vector<2x128xf32>
    %12 = arith.addf %11, %10 : vector<2x128xf32>
    %cst_8 = arith.constant 9.990000e-01 : f32
    %13 = vector.broadcast %cst_8 : f32 to vector<2x128xf32>
    %14 = arith.cmpf ogt, %12, %13 : vector<2x128xf32>
    %15 = arith.extui %14 : vector<2x128xi1> to vector<2x128xi8>
    %c0_9 = arith.constant 0 : index
    %c0_10 = arith.constant 0 : index
    %c0_11 = arith.constant 0 : index
    %16 = vector.load %arg5[%c0_9, %c0_10, %c0_11] : memref<8x2x128xi8, #tpu.memory_space<vmem>>, vector<1x2x128xi8>
    %17 = vector.shape_cast %16 : vector<1x2x128xi8> to vector<2x128xi8>
    %18 = vector.shape_cast %15 : vector<2x128xi8> to vector<1x2x128xi8>
    tpu.vector_store %arg5[%c0_9, %c0_10, %c0_11], %18 {strides = array<i32>} : memref<8x2x128xi8, #tpu.memory_space<vmem>>, vector<1x2x128xi8>,
    %cst_12 = arith.constant 9.990000e-01 : f32
    %19 = vector.broadcast %cst_12 : f32 to vector<2x128xf32>
    %20 = arith.subf %12, %19 : vector<2x128xf32>
    %21 = arith.select %14, %20, %12 : vector<2x128xi1>, vector<2x128xf32>
    %22 = arith.addf %21, %10 : vector<2x128xf32>
    %cst_13 = arith.constant 9.990000e-01 : f32
    %23 = vector.broadcast %cst_13 : f32 to vector<2x128xf32>
    %24 = arith.cmpf ogt, %22, %23 : vector<2x128xf32>
    %25 = arith.extui %24 : vector<2x128xi1> to vector<2x128xi8>
    %c1 = arith.constant 1 : index
    %c0_14 = arith.constant 0 : index
    %c0_15 = arith.constant 0 : index
    %26 = vector.load %arg5[%c1, %c0_14, %c0_15] : memref<8x2x128xi8, #tpu.memory_space<vmem>>, vector<1x2x128xi8>
    %27 = vector.shape_cast %26 : vector<1x2x128xi8> to vector<2x128xi8>
    %28 = vector.shape_cast %25 : vector<2x128xi8> to vector<1x2x128xi8>
    tpu.vector_store %arg5[%c1, %c0_14, %c0_15], %28 {strides = array<i32>} : memref<8x2x128xi8, #tpu.memory_space<vmem>>, vector<1x2x128xi8>,
    %cst_16 = arith.constant 9.990000e-01 : f32
    %29 = vector.broadcast %cst_16 : f32 to vector<2x128xf32>
    %30 = arith.subf %22, %29 : vector<2x128xf32>
    %31 = arith.select %24, %30, %22 : vector<2x128xi1>, vector<2x128xf32>
    %32 = arith.addf %31, %10 : vector<2x128xf32>
    %cst_17 = arith.constant 9.990000e-01 : f32
    %33 = vector.broadcast %cst_17 : f32 to vector<2x128xf32>
    %34 = arith.cmpf ogt, %32, %33 : vector<2x128xf32>
    %35 = arith.extui %34 : vector<2x128xi1> to vector<2x128xi8>
    %c2 = arith.constant 2 : index
    %c0_18 = arith.constant 0 : index
    %c0_19 = arith.constant 0 : index
    %36 = vector.load %arg5[%c2, %c0_18, %c0_19] : memref<8x2x128xi8, #tpu.memory_space<vmem>>, vector<1x2x128xi8>
    %37 = vector.shape_cast %36 : vector<1x2x128xi8> to vector<2x128xi8>
    %38 = vector.shape_cast %35 : vector<2x128xi8> to vector<1x2x128xi8>
    tpu.vector_store %arg5[%c2, %c0_18, %c0_19], %38 {strides = array<i32>} : memref<8x2x128xi8, #tpu.memory_space<vmem>>, vector<1x2x128xi8>,
    %cst_20 = arith.constant 9.990000e-01 : f32
    %39 = vector.broadcast %cst_20 : f32 to vector<2x128xf32>
    %40 = arith.subf %32, %39 : vector<2x128xf32>
    %41 = arith.select %34, %40, %32 : vector<2x128xi1>, vector<2x128xf32>
    %42 = arith.addf %41, %10 : vector<2x128xf32>
    %cst_21 = arith.constant 9.990000e-01 : f32
    %43 = vector.broadcast %cst_21 : f32 to vector<2x128xf32>
    %44 = arith.cmpf ogt, %42, %43 : vector<2x128xf32>
    %45 = arith.extui %44 : vector<2x128xi1> to vector<2x128xi8>
    %c3 = arith.constant 3 : index
    %c0_22 = arith.constant 0 : index
    %c0_23 = arith.constant 0 : index
    %46 = vector.load %arg5[%c3, %c0_22, %c0_23] : memref<8x2x128xi8, #tpu.memory_space<vmem>>, vector<1x2x128xi8>
    %47 = vector.shape_cast %46 : vector<1x2x128xi8> to vector<2x128xi8>
    %48 = vector.shape_cast %45 : vector<2x128xi8> to vector<1x2x128xi8>
    tpu.vector_store %arg5[%c3, %c0_22, %c0_23], %48 {strides = array<i32>} : memref<8x2x128xi8, #tpu.memory_space<vmem>>, vector<1x2x128xi8>,
    %cst_24 = arith.constant 9.990000e-01 : f32
    %49 = vector.broadcast %cst_24 : f32 to vector<2x128xf32>
    %50 = arith.subf %42, %49 : vector<2x128xf32>
    %51 = arith.select %44, %50, %42 : vector<2x128xi1>, vector<2x128xf32>
    %52 = arith.addf %51, %10 : vector<2x128xf32>
    %cst_25 = arith.constant 9.990000e-01 : f32
    %53 = vector.broadcast %cst_25 : f32 to vector<2x128xf32>
    %54 = arith.cmpf ogt, %52, %53 : vector<2x128xf32>
    %55 = arith.extui %54 : vector<2x128xi1> to vector<2x128xi8>
    %c4 = arith.constant 4 : index
    %c0_26 = arith.constant 0 : index
    %c0_27 = arith.constant 0 : index
    %56 = vector.load %arg5[%c4, %c0_26, %c0_27] : memref<8x2x128xi8, #tpu.memory_space<vmem>>, vector<1x2x128xi8>
    %57 = vector.shape_cast %56 : vector<1x2x128xi8> to vector<2x128xi8>
    %58 = vector.shape_cast %55 : vector<2x128xi8> to vector<1x2x128xi8>
    tpu.vector_store %arg5[%c4, %c0_26, %c0_27], %58 {strides = array<i32>} : memref<8x2x128xi8, #tpu.memory_space<vmem>>, vector<1x2x128xi8>,
    %cst_28 = arith.constant 9.990000e-01 : f32
    %59 = vector.broadcast %cst_28 : f32 to vector<2x128xf32>
    %60 = arith.subf %52, %59 : vector<2x128xf32>
    %61 = arith.select %54, %60, %52 : vector<2x128xi1>, vector<2x128xf32>
    %62 = arith.addf %61, %10 : vector<2x128xf32>
    %cst_29 = arith.constant 9.990000e-01 : f32
    %63 = vector.broadcast %cst_29 : f32 to vector<2x128xf32>
    %64 = arith.cmpf ogt, %62, %63 : vector<2x128xf32>
    %65 = arith.extui %64 : vector<2x128xi1> to vector<2x128xi8>
    %c5 = arith.constant 5 : index
    %c0_30 = arith.constant 0 : index
    %c0_31 = arith.constant 0 : index
    %66 = vector.load %arg5[%c5, %c0_30, %c0_31] : memref<8x2x128xi8, #tpu.memory_space<vmem>>, vector<1x2x128xi8>
    %67 = vector.shape_cast %66 : vector<1x2x128xi8> to vector<2x128xi8>
    %68 = vector.shape_cast %65 : vector<2x128xi8> to vector<1x2x128xi8>
    tpu.vector_store %arg5[%c5, %c0_30, %c0_31], %68 {strides = array<i32>} : memref<8x2x128xi8, #tpu.memory_space<vmem>>, vector<1x2x128xi8>,
    %cst_32 = arith.constant 9.990000e-01 : f32
    %69 = vector.broadcast %cst_32 : f32 to vector<2x128xf32>
    %70 = arith.subf %62, %69 : vector<2x128xf32>
    %71 = arith.select %64, %70, %62 : vector<2x128xi1>, vector<2x128xf32>
    %72 = arith.addf %71, %10 : vector<2x128xf32>
    %cst_33 = arith.constant 9.990000e-01 : f32
    %73 = vector.broadcast %cst_33 : f32 to vector<2x128xf32>
    %74 = arith.cmpf ogt, %72, %73 : vector<2x128xf32>
    %75 = arith.extui %74 : vector<2x128xi1> to vector<2x128xi8>
    %c6 = arith.constant 6 : index
    %c0_34 = arith.constant 0 : index
    %c0_35 = arith.constant 0 : index
    %76 = vector.load %arg5[%c6, %c0_34, %c0_35] : memref<8x2x128xi8, #tpu.memory_space<vmem>>, vector<1x2x128xi8>
    %77 = vector.shape_cast %76 : vector<1x2x128xi8> to vector<2x128xi8>
    %78 = vector.shape_cast %75 : vector<2x128xi8> to vector<1x2x128xi8>
    tpu.vector_store %arg5[%c6, %c0_34, %c0_35], %78 {strides = array<i32>} : memref<8x2x128xi8, #tpu.memory_space<vmem>>, vector<1x2x128xi8>,
    %cst_36 = arith.constant 9.990000e-01 : f32
    %79 = vector.broadcast %cst_36 : f32 to vector<2x128xf32>
    %80 = arith.subf %72, %79 : vector<2x128xf32>
    %81 = arith.select %74, %80, %72 : vector<2x128xi1>, vector<2x128xf32>
    %82 = arith.addf %81, %10 : vector<2x128xf32>
    %cst_37 = arith.constant 9.990000e-01 : f32
    %83 = vector.broadcast %cst_37 : f32 to vector<2x128xf32>
    %84 = arith.cmpf ogt, %82, %83 : vector<2x128xf32>
    %85 = arith.extui %84 : vector<2x128xi1> to vector<2x128xi8>
    %c7 = arith.constant 7 : index
    %c0_38 = arith.constant 0 : index
    %c0_39 = arith.constant 0 : index
    %86 = vector.load %arg5[%c7, %c0_38, %c0_39] : memref<8x2x128xi8, #tpu.memory_space<vmem>>, vector<1x2x128xi8>
    %87 = vector.shape_cast %86 : vector<1x2x128xi8> to vector<2x128xi8>
    %88 = vector.shape_cast %85 : vector<2x128xi8> to vector<1x2x128xi8>
    tpu.vector_store %arg5[%c7, %c0_38, %c0_39], %88 {strides = array<i32>} : memref<8x2x128xi8, #tpu.memory_space<vmem>>, vector<1x2x128xi8>,
    return
  }
  func.func @transform_0(%arg0: i32) -> (i32, i32) {
    %c0_i32 = arith.constant 0 : i32
    %c0_i32_0 = arith.constant 0 : i32
    return %arg0, %c0_i32 : i32, i32
  }
  func.func @transform_1(%arg0: i32) -> (i32, i32) {
    %c0_i32 = arith.constant 0 : i32
    %c0_i32_0 = arith.constant 0 : i32
    %c0_i32_1 = arith.constant 0 : i32
    return %c0_i32, %c0_i32_0 : i32, i32
  }
  func.func @transform_2(%arg0: i32) -> (i32, i32) {
    %c0_i32 = arith.constant 0 : i32
    %c0_i32_0 = arith.constant 0 : i32
    %c0_i32_1 = arith.constant 0 : i32
    return %c0_i32, %c0_i32_0 : i32, i32
  }
  func.func @transform_3(%arg0: i32) -> (i32, i32) {
    %c0_i32 = arith.constant 0 : i32
    %c0_i32_0 = arith.constant 0 : i32
    %c0_i32_1 = arith.constant 0 : i32
    return %c0_i32, %c0_i32_0 : i32, i32
  }
  func.func @transform_4(%arg0: i32) -> (i32, i32, i32) {
    %c0_i32 = arith.constant 0 : i32
    %c0_i32_0 = arith.constant 0 : i32
    %c0_i32_1 = arith.constant 0 : i32
    return %c0_i32, %arg0, %c0_i32_0 : i32, i32, i32
  }
}

</mosaic_0001>

<bundles_post_ra>
// kernel: tpu_custom_call.1
= control target key start
LH: loop header
LB: loop body
LE: loop exit
PB: predicated region body
PF: predicated region fallthrough
CT: control target
= control target key end

     0   :  { %9 = vsyncpa [#allocation3], 0  ;;  %s444_s0 = inlined_call_operand.hbm [shape: f32[2,8], index: 0, kind: input, shape index: {}]   ;;  %s445_s1 = inlined_call_operand.hbm [shape: f32[8,128], index: 1, kind: input, shape index: {}]   ;;  %s446_s2 = inlined_call_operand.vmem [shape: f32[1,128], index: 2, kind: input, shape index: {}]   ;;  %s447_s3 = inlined_call_operand.vmem [shape: f32[1,128], index: 3, kind: input, shape index: {}]   ;;  %s448_s4 = inlined_call_operand.vmem [shape: s8[8,2,128], index: 4, kind: output, shape index: {}]  }
   0x1   :  { %10 = vsyncpa [#allocation5], 0  ;;  %s314_s15 = smov [#allocation2]   ;;  %s315_s17 = smov [#allocation4]  }
   0x2   :  { %s17_s16 = sshll.u32 %s314_s15, 4  ;;  %s27_s18 = sshll.u32 %s315_s17, 4  ;;  %s18_s16 = int_to_ptr.vmem [resolvable:$true] %s17_s16  ;;  %s28_s18 = int_to_ptr.vmem [resolvable:$true] %s27_s18 }
   0x3   :  { %s278_s19 = scalar_lea.vmem %s18_s16, 32  ;;  %p283_p1 = scmp.lt.s32.totalorder %s18_s16, %s18_s16 }
   0x4   :  { %p279_p0 = scmp.ne.s32.totalorder %s18_s16, %s278_s19  ;;  %p284_p2 = scmp.lt.s32.totalorder %s278_s19, %s278_s19 }
   0x6   :  { %p285_p3 = por %p284_p2, %p283_p1 }
   0x8   :  { %p286_p4 = pnand %p285_p3, %p279_p0 }
   0xa   :  { %289 = shalt.err (!%p286_p4)
}
   0xb   :  { %20 = dma.hbm_to_vmem [thread:$0]  %s444_s0, 32, %s18_s16, [#allocation3]  }
   0xc   :  { %s298_s22 = scalar_lea.vmem %s28_s18, 128  ;;  %p303_p6 = scmp.lt.s32.totalorder %s28_s18, %s28_s18 }
   0xd   :  { %p299_p5 = scmp.ne.s32.totalorder %s28_s18, %s298_s22  ;;  %p304_p7 = scmp.lt.s32.totalorder %s298_s22, %s298_s22 }
   0xf   :  { %p305_p8 = por %p304_p7, %p303_p6 }
  0x11   :  { %p306_p9 = pnand %p305_p8, %p299_p5 }
  0x13   :  { %309 = shalt.err (!%p306_p9)
}
  0x14   :  { %30 = dma.hbm_to_vmem [thread:$0]  %s445_s1, 128, %s28_s18, [#allocation5]  }
  0x15   :  { %310 = dma.done.wait [#allocation3], 32  }
  0x16   :  { %311 = vsyncadd [#allocation3], 4294967264 }
  0x17   :  { %312 = dma.done.wait [#allocation5], 128  }
  0x18   :  { %313 = vsyncadd [#allocation5], 4294967168  ;;  %v316_v0 = vmov 0.0   ;;  %vm317_vm0 = vmmov 0   ;;  %vm45_vm1 = vcmask 64512   ;;  %v44_v1 = vld [vmem:[#allocation4] sm:$0xff] }
  0x19   :  { %258 = vmatprep.subr.mxu0 %v316_v0  ;;  %260 = vmatprep.mubr.msk.f32.mxu0 %vm317_vm0, %v316_v0  ;;  %v43_v2 = vld [vmem:[#allocation2] sm:$0x3]  ;;  %vm143_vm2 = vcmask 1040384   ;;  %vm144_vm3 = vsmask.f32 256  ;;  %v318_v16 = vmov 0  }
  0x1a   :  { %259 = vmatpush3.msra.mxu0 %v44_v1  ;;  %v233_v3 = vld [vmem:[%s446_s2] ss:$0 sm:$0xff]  ;;  %vm359_vm5 = vmand %vm143_vm2, %vm144_vm3  ;;  %v236_v21 = vld [vmem:[%s448_s4 + $0x1] sm:$0x1] }
  0x1b   :  { %261 = vmatmul.mubr.msk.f32.vlgmr.msra.gmra.mxu0 %vm45_vm1, %v43_v2  ;;  %v234_v6 = vld [vmem:[%s447_s3] ss:$0 sm:$0xff]  ;;  %v239_v27 = vld [vmem:[%s448_s4 + $0x2] sm:$0x1]  ;;  %v242_v33 = vld [vmem:[%s448_s4 + $0x3] sm:$0x1] }
  0x1c   :  { %v146_v14 = vld [vmem:[%s448_s4] sm:$0x1]  ;;  %v245_v39 = vld [vmem:[%s448_s4 + $0x4] sm:$0x1]  ;;  %v248_v45 = vld [vmem:[%s448_s4 + $0x5] sm:$0x1] }
  0x1d   :  { %v251_v51 = vld [vmem:[%s448_s4 + $0x6] sm:$0x1]  ;;  %v254_v56 = vld [vmem:[%s448_s4 + $0x7] sm:$0x1] }
  0xdb   :  { %v115_v4 = vpop.f32.mrf.mxu0 }
  0xdc   :  { %v126_v5 = vsub.f32 %v115_v4, %v233_v3 }
  0xdd   :  { %v262_v7 = vpop.f32.mrf.mxu0 }
  0xde   :  { %v127_v8 = vmul.f32 %v126_v5, %v126_v5 }
  0xe0   :  { %v135_v9 = vmul.f32 %v234_v6, %v127_v8 }
  0xe2   :  { %v136_v10 = vmul.f32 1.442695, %v135_v9 }
  0xe4   :  { %268 = vpow2.f32 %v136_v10 }
  0xf1   :  { %v356_v11 = vpop.eup %268 }
  0xf2   :  { %vm139_vm4 = vcmp.gt.f32.partialorder %v356_v11, 0.999  ;;  %v235_v13 = vadd.f32 -0.999, %v356_v11 }
  0xf3   :  { %vm140_vm6 = vmpackc.low %vm139_vm4, %vm139_vm4 }
  0xf4   :  { %vm141_vm7 = vmpackc.even %vm140_vm6, %vm140_vm6  ;;  %v150_v15 = vsel %vm139_vm4, %v235_v13, %v356_v11 }
  0xf5   :  { %v142_v17 = vsel %vm141_vm7, 16843009, %v318_v16  ;;  %v151_v18 = vadd.f32 %v356_v11, %v150_v15 }
  0xf6   :  { %v147_v19 = vsel %vm359_vm5, %v142_v17, %v146_v14 }
  0xf7   :  { %148 = vst [vmem:[%s448_s4] sm:$0x1] %v147_v19  ;;  %vm152_vm8 = vcmp.gt.f32.partialorder %v151_v18, 0.999  ;;  %v238_v20 = vadd.f32 -0.999, %v151_v18 }
  0xf8   :  { %vm153_vm9 = vmpackc.low %vm152_vm8, %vm152_vm8 }
  0xf9   :  { %vm154_vm10 = vmpackc.even %vm153_vm9, %vm153_vm9  ;;  %v161_v22 = vsel %vm152_vm8, %v238_v20, %v151_v18 }
  0xfa   :  { %v155_v23 = vsel %vm154_vm10, 16843009, %v318_v16  ;;  %v162_v24 = vadd.f32 %v356_v11, %v161_v22 }
  0xfb   :  { %v158_v25 = vsel %vm359_vm5, %v155_v23, %v236_v21 }
  0xfc   :  { %237 = vst [vmem:[%s448_s4 + $0x1] sm:$0x1] %v158_v25  ;;  %vm163_vm11 = vcmp.gt.f32.partialorder %v162_v24, 0.999  ;;  %v241_v26 = vadd.f32 -0.999, %v162_v24 }
  0xfd   :  { %vm164_vm12 = vmpackc.low %vm163_vm11, %vm163_vm11 }
  0xfe   :  { %vm165_vm13 = vmpackc.even %vm164_vm12, %vm164_vm12  ;;  %v172_v28 = vsel %vm163_vm11, %v241_v26, %v162_v24 }
  0xff   :  { %v166_v29 = vsel %vm165_vm13, 16843009, %v318_v16  ;;  %v173_v30 = vadd.f32 %v356_v11, %v172_v28 }
 0x100   :  { %v169_v31 = vsel %vm359_vm5, %v166_v29, %v239_v27 }
 0x101   :  { %240 = vst [vmem:[%s448_s4 + $0x2] sm:$0x1] %v169_v31  ;;  %vm174_vm14 = vcmp.gt.f32.partialorder %v173_v30, 0.999  ;;  %v244_v32 = vadd.f32 -0.999, %v173_v30 }
 0x102   :  { %vm175_vm15 = vmpackc.low %vm174_vm14, %vm174_vm14 }
 0x103   :  { %vm176_vm0 = vmpackc.even %vm175_vm15, %vm175_vm15  ;;  %v183_v34 = vsel %vm174_vm14, %v244_v32, %v173_v30 }
 0x104   :  { %v177_v35 = vsel %vm176_vm0, 16843009, %v318_v16  ;;  %v184_v36 = vadd.f32 %v356_v11, %v183_v34 }
 0x105   :  { %v180_v37 = vsel %vm359_vm5, %v177_v35, %v242_v33 }
 0x106   :  { %243 = vst [vmem:[%s448_s4 + $0x3] sm:$0x1] %v180_v37  ;;  %vm185_vm1 = vcmp.gt.f32.partialorder %v184_v36, 0.999  ;;  %v247_v38 = vadd.f32 -0.999, %v184_v36 }
 0x107   :  { %vm186_vm2 = vmpackc.low %vm185_vm1, %vm185_vm1 }
 0x108   :  { %vm187_vm3 = vmpackc.even %vm186_vm2, %vm186_vm2  ;;  %v194_v40 = vsel %vm185_vm1, %v247_v38, %v184_v36 }
 0x109   :  { %v188_v41 = vsel %vm187_vm3, 16843009, %v318_v16  ;;  %v195_v42 = vadd.f32 %v356_v11, %v194_v40 }
 0x10a   :  { %v191_v43 = vsel %vm359_vm5, %v188_v41, %v245_v39 }
 0x10b   :  { %246 = vst [vmem:[%s448_s4 + $0x4] sm:$0x1] %v191_v43  ;;  %vm196_vm4 = vcmp.gt.f32.partialorder %v195_v42, 0.999  ;;  %v250_v44 = vadd.f32 -0.999, %v195_v42 }
 0x10c   :  { %vm197_vm6 = vmpackc.low %vm196_vm4, %vm196_vm4 }
 0x10d   :  { %vm198_vm7 = vmpackc.even %vm197_vm6, %vm197_vm6  ;;  %v205_v46 = vsel %vm196_vm4, %v250_v44, %v195_v42 }
 0x10e   :  { %v199_v47 = vsel %vm198_vm7, 16843009, %v318_v16  ;;  %v206_v48 = vadd.f32 %v356_v11, %v205_v46 }
 0x10f   :  { %v202_v49 = vsel %vm359_vm5, %v199_v47, %v248_v45 }
 0x110   :  { %249 = vst [vmem:[%s448_s4 + $0x5] sm:$0x1] %v202_v49  ;;  %vm207_vm8 = vcmp.gt.f32.partialorder %v206_v48, 0.999  ;;  %v253_v50 = vadd.f32 -0.999, %v206_v48 }
 0x111   :  { %vm208_vm9 = vmpackc.low %vm207_vm8, %vm207_vm8 }
 0x112   :  { %vm209_vm10 = vmpackc.even %vm208_vm9, %vm208_vm9  ;;  %v216_v52 = vsel %vm207_vm8, %v253_v50, %v206_v48 }
 0x113   :  { %v210_v53 = vsel %vm209_vm10, 16843009, %v318_v16  ;;  %v217_v54 = vadd.f32 %v356_v11, %v216_v52 }
 0x114   :  { %v213_v55 = vsel %vm359_vm5, %v210_v53, %v251_v51 }
 0x115   :  { %252 = vst [vmem:[%s448_s4 + $0x6] sm:$0x1] %v213_v55  ;;  %vm218_vm11 = vcmp.gt.f32.partialorder %v217_v54, 0.999 }
 0x116   :  { %vm219_vm12 = vmpackc.low %vm218_vm11, %vm218_vm11 }
 0x117   :  { %vm220_vm13 = vmpackc.even %vm219_vm12, %vm219_vm12 }
 0x118   :  { %v221_v57 = vsel %vm220_vm13, 16843009, %v318_v16 }
 0x119   :  { %v224_v58 = vsel %vm359_vm5, %v221_v57, %v254_v56 }
 0x11a   :  { %255 = vst [vmem:[%s448_s4 + $0x7] sm:$0x1] %v224_v58 }
 0x11b   :  { %230 = vsyncpa [#allocation3], 1 }
 0x11c   :  { %231 = vsyncpa [#allocation5], 1 }

</bundles_post_ra>
